<compile_context>
chip_gen: v7x
topology: tpu7x:2x2x1
jax: 0.10.0
libtpu: 0.0.40
codegen_flags: <defaults>
</compile_context>

<pallas_src>
import functools
import math

import jax
import jax.numpy as jnp
from jax.experimental import pallas as pl
from jax.experimental.pallas import tpu as pltpu


# ---------------------------------------------------------------------------
# Generation-aware configuration
# ---------------------------------------------------------------------------

def _round_up(x, m):
    return ((x + m - 1) // m) * m


def _tpu_generation():
    """Best-effort TPU generation string: 'v5e' | 'v6e' | 'v7x' | ''."""
    try:
        kind = jax.devices()[0].device_kind.lower()
    except Exception:
        return ""
    if "v7" in kind or "7x" in kind:
        return "v7x"
    if "v6" in kind:
        return "v6e"
    if "v5" in kind:
        return "v5e"
    return ""


# Tile presets + scoped-VMEM ceilings per generation.
_PRESETS = {
    # 64 MiB physical VMEM per TC, 2 TCs sharded over the parallel grid axes.
    "v7x": dict(tm=512, tn=1024, tk=1024, align=256, vmem_cap=44 * 2**20, two_cores=True),
    # 128 MiB VMEM, 2x256x256 MXU -> widest N tiles (fewest x re-reads).
    "v6e": dict(tm=512, tn=2048, tk=1024, align=256, vmem_cap=96 * 2**20, two_cores=False),
    # 128 MiB VMEM, 4x128x128 MXU, single vector-store slot -> favour large tk.
    "v5e": dict(tm=512, tn=1024, tk=2048, align=128, vmem_cap=96 * 2**20, two_cores=False),
    # Unknown chip: conservative (fits a 64 MiB part).
    "":    dict(tm=512, tn=1024, tk=1024, align=128, vmem_cap=44 * 2**20, two_cores=False),
}


def _preset():
    return _PRESETS[_tpu_generation()]


def _choose_tile(padded_dim, max_tile, align):
    """Largest multiple of `align` <= min(max_tile, padded_dim) dividing padded_dim."""
    cap = min(max_tile, padded_dim)
    t = max(align, (cap // align) * align)
    while t > align and padded_dim % t:
        t -= align
    return t


def _pad_dim(dim, tile_target, align):
    """Pad `dim` so a large tile divides it; tiny dims only pad to `align`."""
    g = tile_target
    while g > align and dim < g:
        g //= 2
    g = max(g, align)
    return _round_up(dim, g)


# ---------------------------------------------------------------------------
# Kernel
# ---------------------------------------------------------------------------

def _fc_kernel(x_ref, wt_ref, b_ref, o_ref, acc_ref, *, relu: bool):
    # grid = (M blocks, N blocks, K blocks); axis 2 (K) is the sequential
    # reduction.  acc_ref is an f32 VMEM scratch that persists across k.
    k = pl.program_id(2)

    @pl.when(k == 0)
    def _():
        # Fold the bias into the reduction init.
        acc_ref[...] = jnp.broadcast_to(b_ref[...], acc_ref.shape)

    acc_ref[...] += jnp.dot(
        x_ref[...], wt_ref[...], preferred_element_type=jnp.float32
    )

    @pl.when(k == pl.num_programs(2) - 1)
    def _():
        y = acc_ref[...]
        if relu:
            y = jnp.maximum(y, 0.0)
        o_ref[...] = y.astype(o_ref.dtype)


# ---------------------------------------------------------------------------
# Wrapper
# ---------------------------------------------------------------------------

def fc_forward_padded(x, wt_padded, bias_padded, n_out, *, relu=True,
                      compute_dtype=jnp.bfloat16, out_dtype=jnp.float32,
                      tm=None, tn=None, tk=None, w_buffers=2):
    """y = x @ W.T + b (optional ReLU).

    x:           (M, K) activations.
    wt_padded:   (Kp, Np) pre-transposed / zero-padded weight in compute_dtype.
    bias_padded: (1, Np) float32.
    n_out:       true (unpadded) number of output features.
    """
    M, K = x.shape
    Kp, Np = wt_padded.shape
    assert Kp >= K and Kp % 128 == 0 and Np % 128 == 0
    assert bias_padded.shape == (1, Np)

    cfg = _preset()
    align_n = cfg["align"] if Np % cfg["align"] == 0 else 128
    align_k = cfg["align"] if Kp % cfg["align"] == 0 else 128

    tm = tm or cfg["tm"]
    tn = tn or cfg["tn"]
    tk = tk or cfg["tk"]

    # Clamp tiles to the (padded) problem, keeping MXU-friendly alignment.
    tm = max(8, (min(tm, _round_up(M, 8)) // 8) * 8)
    tn = _choose_tile(Np, tn, align_n)
    tk = _choose_tile(Kp, tk, align_k)

    in_b = jnp.dtype(compute_dtype).itemsize
    out_b = jnp.dtype(out_dtype).itemsize
    wbuf = max(2, int(w_buffers))

    def footprint(tm_, tn_, tk_):
        return (2 * tm_ * tk_ * in_b          # x tiles (double-buffered)
                + wbuf * tk_ * tn_ * in_b     # weight tiles
                + 2 * tm_ * tn_ * out_b       # output tiles
                + tm_ * tn_ * 4               # f32 accumulator scratch
                + 2 * tn_ * 4)                # bias tiles

    # Shrink only if a custom/preset config overshoots the generation ceiling.
    while footprint(tm, tn, tk) > cfg["vmem_cap"]:
        if tk > 128:
            tk = _choose_tile(Kp, tk // 2, 128)
        elif tn > 128:
            tn = _choose_tile(Np, tn // 2, 128)
        elif tm > 8:
            tm = max(8, (tm // 2 // 8) * 8)
        else:
            break

    grid_m = pl.cdiv(M, tm)
    grid_n = pl.cdiv(n_out, tn)

    # v7x: 2 TensorCores are sharded over the "parallel" grid axes — make sure a
    # small-batch call still exposes >= 2 parallel grid points.
    if cfg["two_cores"] and grid_m * grid_n < 2 and Np >= 2 * align_n:
        tn = _choose_tile(Np, max(align_n, Np // 2), align_n)
        grid_n = pl.cdiv(n_out, tn)

    grid_k = Kp // tk

    # Only the K axis of x may need a zero pad (a garbage K region could be
    # NaN/Inf and would poison every output column).  The M axis relies on
    # Pallas partial-edge blocks: OOB rows only feed output rows that are
    # dropped on writeback, so no full-tensor pad copy is needed.
    x_c = x.astype(compute_dtype) if x.dtype != compute_dtype else x
    if K != Kp:
        x_c = jnp.pad(x_c, ((0, 0), (0, Kp - K)))

    vmem_limit = int(min(cfg["vmem_cap"],
                         max(2 * footprint(tm, tn, tk), 16 * 2**20)))

    w_spec_kwargs = {}
    if wbuf > 2:
        # Deeper buffering on the dominant streamed operand (weights) only.
        w_spec_kwargs["pipeline_mode"] = pl.Buffered(wbuf)
    wt_spec = pl.BlockSpec((tk, tn), lambda i, j, k: (k, j), **w_spec_kwargs)

    cost = pl.CostEstimate(
        flops=int(2 * (grid_m * tm) * (grid_n * tn) * Kp),
        transcendentals=0,
        bytes_accessed=int(M * Kp * in_b + Kp * Np * in_b
                           + Np * 4 + M * n_out * out_b),
    )

    out = pl.pallas_call(
        functools.partial(_fc_kernel, relu=relu),
        out_shape=jax.ShapeDtypeStruct((M, n_out), out_dtype),
        grid_spec=pltpu.PrefetchScalarGridSpec(
            num_scalar_prefetch=0,
            grid=(grid_m, grid_n, grid_k),
            in_specs=[
                pl.BlockSpec((tm, tk), lambda i, j, k: (i, k)),   # x tile
                wt_spec,                                          # W.T tile
                pl.BlockSpec((1, tn), lambda i, j, k: (0, j)),    # bias tile
            ],
            out_specs=pl.BlockSpec((tm, tn), lambda i, j, k: (i, j)),
            scratch_shapes=[pltpu.VMEM((tm, tn), jnp.float32)],
        ),
        compiler_params=pltpu.CompilerParams(
            dimension_semantics=("parallel", "parallel", "arbitrary"),
            vmem_limit_bytes=vmem_limit,
        ),
        cost_estimate=cost,
    )(x_c, wt_padded, bias_padded)

    return out


class FCPallas:
    """Mirror of the PyTorch FC module (nn.Linear + optional ReLU)."""

    def __init__(self, in_features, out_features, relu=True, key=None,
                 compute_dtype=jnp.bfloat16, out_dtype=jnp.float32):
        if key is None:
            key = jax.random.PRNGKey(0)
        kw, kb = jax.random.split(key)
        # Matches torch.nn.Linear's uniform(-1/sqrt(in), 1/sqrt(in)) init.
        bound = 1.0 / math.sqrt(in_features)
        self.weight = jax.random.uniform(
            kw, (out_features, in_features), jnp.float32, -bound, bound)
        self.bias = jax.random.uniform(
            kb, (out_features,), jnp.float32, -bound, bound)
        self.relu = relu
        self.compute_dtype = compute_dtype
        self.out_dtype = out_dtype
        self.out_features = out_features

        # One-time prep (off the hot path): transpose, pad to the target-tile
        # granularity, and cast the weight to the MXU compute dtype (bf16).
        cfg = _preset()
        Kp = _pad_dim(in_features, cfg["tk"], cfg["align"])
        Np = _pad_dim(out_features, cfg["tn"], cfg["align"])
        self.wt_padded = (
            jnp.zeros((Kp, Np), compute_dtype)
            .at[:in_features, :out_features]
            .set(self.weight.T.astype(compute_dtype))
        )
        self.bias_padded = (
            jnp.zeros((1, Np), jnp.float32).at[0, :out_features].set(self.bias)
        )
        # TODO(synk): int8 (v5e/v6e) / fp8 (v7x) weight paths with per-channel
        # dequant in the epilogue are intentionally out of scope here.

    def __call__(self, x):
        return fc_forward_padded(
            x, self.wt_padded, self.bias_padded, self.out_features,
            relu=self.relu, compute_dtype=self.compute_dtype,
            out_dtype=self.out_dtype)


if __name__ == "__main__":
    key = jax.random.PRNGKey(0)
    kx1, kx2, kp1, kp2 = jax.random.split(key, 4)

    batch, in_features, out_features = 8, 32, 64
    x = jax.random.normal(kx1, (batch, in_features), jnp.float32)

    fc_relu = FCPallas(in_features, out_features, relu=True, key=kp1)
    fc_lin = FCPallas(in_features, out_features, relu=False, key=kp2,
                      out_dtype=jnp.bfloat16)   # bf16-output fast path

    y1 = jax.block_until_ready(fc_relu(x))
    y2 = jax.block_until_ready(fc_lin(x))

    # Odd batch exercises the partial-edge M block (no pad copy, cdiv grid).
    x_odd = jax.random.normal(kx2, (5, in_features), jnp.float32)
    y3 = jax.block_until_ready(fc_relu(x_odd))

    # Reference in plain JAX (inputs routed through bf16 to match the kernel's
    # compute dtype; accumulation in f32 either way).
    def ref(fc, xin, relu):
        xb = xin.astype(jnp.bfloat16).astype(jnp.float32)
        wb = fc.weight.astype(jnp.bfloat16).astype(jnp.float32)
        y = xb @ wb.T + fc.bias
        return jnp.maximum(y, 0.0) if relu else y

    assert y1.shape == (batch, out_features) and y1.dtype == jnp.float32
    assert y2.shape == (batch, out_features) and y2.dtype == jnp.bfloat16
    assert y3.shape == (5, out_features) and y3.dtype == jnp.float32
    assert jnp.allclose(y1, ref(fc_relu, x, True), atol=1e-3, rtol=1e-3)
    assert jnp.allclose(y2.astype(jnp.float32), ref(fc_lin, x, False),
                        atol=3e-2, rtol=3e-2)
    assert jnp.allclose(y3, ref(fc_relu, x_odd, True), atol=1e-3, rtol=1e-3)

    print("KERNEL_OK")
</pallas_src>

<mosaic_0001>
module attributes {stable_mosaic.version = 11 : i64} {
  func.func @_fc_kernel(%arg0: i32, %arg1: i32, %arg2: i32, %arg3: memref<8x128xbf16, #tpu.memory_space<vmem>>, %arg4: memref<128x128xbf16, #tpu.memory_space<vmem>>, %arg5: memref<1x128xf32, #tpu.memory_space<vmem>>, %arg6: memref<8x128xf32, #tpu.memory_space<vmem>>, %arg7: memref<8x128xf32, #tpu.memory_space<vmem>>) attributes {dimension_semantics = [#tpu.dimension_semantics<parallel>, #tpu.dimension_semantics<parallel>, #tpu.dimension_semantics<arbitrary>], iteration_bounds = array<i64: 1, 1, 1>, scalar_prefetch = 0 : i64, scratch_operands = 1 : i64, tpu.core_type = #tpu.core_type<tc>, window_params = [{transform_indices = @transform_0, window_bounds = array<i64: 8, 128>}, {transform_indices = @transform_1, window_bounds = array<i64: 128, 128>}, {transform_indices = @transform_2, window_bounds = array<i64: 1, 128>}, {transform_indices = @transform_3, window_bounds = array<i64: 8, 128>}]} {
    %c0_i32 = arith.constant 0 : i32
    %0 = arith.cmpi eq, %arg2, %c0_i32 : i32
    %1 = arith.extui %0 : i1 to i32
    %c0_i32_0 = arith.constant 0 : i32
    %2 = arith.cmpi ne, %1, %c0_i32_0 : i32
    scf.if %2 {
      %c0_10 = arith.constant 0 : index
      %c0_11 = arith.constant 0 : index
      %12 = vector.load %arg5[%c0_10, %c0_11] : memref<1x128xf32, #tpu.memory_space<vmem>>, vector<1x128xf32>
      %13 = vector.shape_cast %12 : vector<1x128xf32> to vector<1x128xf32>
      %14 = vector.broadcast %13 : vector<1x128xf32> to vector<8x128xf32>
      %c0_12 = arith.constant 0 : index
      %c0_13 = arith.constant 0 : index
      %15 = vector.load %arg7[%c0_12, %c0_13] : memref<8x128xf32, #tpu.memory_space<vmem>>, vector<8x128xf32>
      tpu.vector_store %arg7[%c0_12, %c0_13], %14 {strides = array<i32>} : memref<8x128xf32, #tpu.memory_space<vmem>>, vector<8x128xf32>,
    } else {
    }
    %c0 = arith.constant 0 : index
    %c0_1 = arith.constant 0 : index
    %3 = vector.load %arg7[%c0, %c0_1] : memref<8x128xf32, #tpu.memory_space<vmem>>, vector<8x128xf32>
    %c0_2 = arith.constant 0 : index
    %c0_3 = arith.constant 0 : index
    %4 = vector.load %arg3[%c0_2, %c0_3] : memref<8x128xbf16, #tpu.memory_space<vmem>>, vector<8x128xbf16>
    %c0_4 = arith.constant 0 : index
    %c0_5 = arith.constant 0 : index
    %5 = vector.load %arg4[%c0_4, %c0_5] : memref<128x128xbf16, #tpu.memory_space<vmem>>, vector<128x128xbf16>
    %cst = arith.constant dense<0.000000e+00> : vector<8x128xf32>
    %6 = tpu.matmul %4, %5, %cst {dimension_numbers = #tpu.dot_dimension_numbers<[1], [0], [0], [1], [0, 0, 1, 1], [], []>} : vector<8x128xbf16>, vector<128x128xbf16>, vector<8x128xf32> -> vector<8x128xf32>
    %7 = arith.addf %3, %6 : vector<8x128xf32>
    %c0_6 = arith.constant 0 : index
    %c0_7 = arith.constant 0 : index
    %8 = vector.load %arg7[%c0_6, %c0_7] : memref<8x128xf32, #tpu.memory_space<vmem>>, vector<8x128xf32>
    tpu.vector_store %arg7[%c0_6, %c0_7], %7 {strides = array<i32>} : memref<8x128xf32, #tpu.memory_space<vmem>>, vector<8x128xf32>,
    %c0_i32_8 = arith.constant 0 : i32
    %9 = arith.cmpi eq, %arg2, %c0_i32_8 : i32
    %10 = arith.extui %9 : i1 to i32
    %c0_i32_9 = arith.constant 0 : i32
    %11 = arith.cmpi ne, %10, %c0_i32_9 : i32
    scf.if %11 {
      %c0_10 = arith.constant 0 : index
      %c0_11 = arith.constant 0 : index
      %12 = vector.load %arg7[%c0_10, %c0_11] : memref<8x128xf32, #tpu.memory_space<vmem>>, vector<8x128xf32>
      %cst_12 = arith.constant 0.000000e+00 : f32
      %13 = vector.broadcast %cst_12 : f32 to vector<8x128xf32>
      %14 = arith.maximumf %12, %13 : vector<8x128xf32>
      %c0_13 = arith.constant 0 : index
      %c0_14 = arith.constant 0 : index
      %15 = vector.load %arg6[%c0_13, %c0_14] : memref<8x128xf32, #tpu.memory_space<vmem>>, vector<8x128xf32>
      tpu.vector_store %arg6[%c0_13, %c0_14], %14 {strides = array<i32>} : memref<8x128xf32, #tpu.memory_space<vmem>>, vector<8x128xf32>,
    } else {
    }
    return
  }
  func.func @transform_0(%arg0: i32, %arg1: i32, %arg2: i32) -> (i32, i32) {
    %c0_i32 = arith.constant 0 : i32
    return %arg0, %arg2 : i32, i32
  }
  func.func @transform_1(%arg0: i32, %arg1: i32, %arg2: i32) -> (i32, i32) {
    %c0_i32 = arith.constant 0 : i32
    return %arg2, %arg1 : i32, i32
  }
  func.func @transform_2(%arg0: i32, %arg1: i32, %arg2: i32) -> (i32, i32) {
    %c0_i32 = arith.constant 0 : i32
    %c0_i32_0 = arith.constant 0 : i32
    return %c0_i32, %arg1 : i32, i32
  }
  func.func @transform_3(%arg0: i32, %arg1: i32, %arg2: i32) -> (i32, i32) {
    %c0_i32 = arith.constant 0 : i32
    return %arg0, %arg1 : i32, i32
  }
}

</mosaic_0001>

<bundles_post_ra>
// kernel: tpu_custom_call.1
= control target key start
LH: loop header
LB: loop body
LE: loop exit
PB: predicated region body
PF: predicated region fallthrough
CT: control target
= control target key end

     0   :  { %8 = vsyncpa [#allocation4], 0  ;;  %s382_s0 = inlined_call_operand.hbm [shape: bf16[8,128], index: 0, kind: input, shape index: {}]   ;;  %s383_s1 = inlined_call_operand.hbm [shape: bf16[128,128], index: 1, kind: input, shape index: {}]   ;;  %s384_s2 = inlined_call_operand.vmem [shape: f32[1,128], index: 2, kind: input, shape index: {}]   ;;  %s385_s3 = inlined_call_operand.hbm [shape: f32[8,64], index: 3, kind: output, shape index: {}]  }
   0x1   :  { %9 = vsyncpa [#allocation7], 0 }
   0x2   :  { %10 = vsyncpa [#allocation5], 0  ;;  %s309_s12 = smov [#allocation3]   ;;  %s310_s14 = smov [#allocation6]  }
   0x3   :  { %s17_s13 = sshll.u32 %s309_s12, 4  ;;  %s26_s15 = sshll.u32 %s310_s14, 4  ;;  %s18_s13 = int_to_ptr.vmem [resolvable:$true] %s17_s13  ;;  %s336_s15 = int_to_ptr.vmem [resolvable:$true] %s26_s15 }
   0x4   :  { %s237_s18 = scalar_lea.hbm %s382_s0, 64 }
   0x5   :  { %p238_p0 = scmp.ne.s32.totalorder %s382_s0, %s237_s18  ;;  %p241_p1 = scmp.lt.u32.totalorder %s237_s18, %s382_s0 }
   0x7   :  { %p243_p2 = pnand %p241_p1, %p238_p0 }
   0x9   :  { %246 = shalt.err (!%p243_p2)
}
   0xa   :  { %s247_s23 = scalar_lea.vmem %s18_s13, 64  ;;  %p252_p4 = scmp.lt.s32.totalorder %s18_s13, %s18_s13 }
   0xb   :  { %p248_p3 = scmp.ne.s32.totalorder %s18_s13, %s247_s23  ;;  %p253_p5 = scmp.lt.s32.totalorder %s247_s23, %s247_s23 }
   0xd   :  { %p254_p6 = por %p253_p5, %p252_p4 }
   0xf   :  { %p255_p7 = pnand %p254_p6, %p248_p3 }
  0x11   :  { %258 = shalt.err (!%p255_p7)
}
  0x12   :  { %20 = dma.hbm_to_vmem [thread:$0]  %s382_s0, 64, %s18_s13, [#allocation4]  }
  0x13   :  { %s259_s28 = scalar_lea.hbm %s383_s1, 1024 }
  0x14   :  { %p260_p8 = scmp.ne.s32.totalorder %s383_s1, %s259_s28  ;;  %p263_p9 = scmp.lt.u32.totalorder %s259_s28, %s383_s1 }
  0x16   :  { %p265_p10 = pnand %p263_p9, %p260_p8 }
  0x18   :  { %268 = shalt.err (!%p265_p10)
}
  0x19   :  { %s269_s6 = scalar_lea.vmem %s336_s15, 1024  ;;  %p274_p12 = scmp.lt.s32.totalorder %s336_s15, %s336_s15 }
  0x1a   :  { %p270_p11 = scmp.ne.s32.totalorder %s336_s15, %s269_s6  ;;  %p275_p13 = scmp.lt.s32.totalorder %s269_s6, %s269_s6 }
  0x1c   :  { %p276_p0 = por %p275_p13, %p274_p12 }
  0x1e   :  { %p277_p1 = pnand %p276_p0, %p270_p11 }
  0x20   :  { %280 = shalt.err (!%p277_p1)
}
  0x21   :  { %s311_s0 = smov 64   ;;  %s312_s7 = smov 4  }
  0x22   :  { %32 = dma.hbm_to_vmem [thread:$0]  %s383_s1, 1024, %s336_s15, [#allocation7], %s311_s0, %s311_s0, %s312_s7  }
  0x23   :  { %303 = dma.done.wait [#allocation4], 64  }
  0x24   :  { %304 = vsyncadd [#allocation4], 4294967232 }
  0x25   :  { %305 = dma.done.wait [#allocation7], 1024  }
  0x26   :  { %306 = vsyncadd [#allocation7], 4294966272  ;;  %v313_v0 = vmov 0.0   ;;  %vm314_vm0 = vmmov 0   ;;  %v229_v1 = vld [vmem:[#allocation6] sm:$0xff]   ;;  %v230_v2 = vld [vmem:[#allocation6 + $0x8] sm:$0xff]  }
  0x27   :  { %202 = vmatprep.subr.bf16.mxu0 %v313_v0  ;;  %218 = vmatprep.mubr.msk.bf16.mxu0 %vm314_vm0, %v313_v0  ;;  %v231_v3 = vld [vmem:[#allocation6 + $0x10] sm:$0xff]   ;;  %v232_v4 = vld [vmem:[#allocation6 + $0x18] sm:$0xff]   ;;  %v233_v5 = vld [vmem:[#allocation6 + $0x20] sm:$0xff]   ;;  %s315_s11 = smov [#allocation8]  }
  0x28   :  { %203 = vmatpush3.bf16.msra.mxu0 %v229_v1  ;;  %v234_v6 = vld [vmem:[#allocation6 + $0x28] sm:$0xff]   ;;  %v235_v7 = vld [vmem:[#allocation6 + $0x30] sm:$0xff]   ;;  %v236_v8 = vld [vmem:[#allocation6 + $0x38] sm:$0xff]   ;;  %s174_s12 = sshll.u32 %s315_s11, 4  ;;  %s175_s12 = int_to_ptr.vmem [resolvable:$true] %s174_s12 }
  0x29   :  { %204 = vmatprep.subr.bf16.mxu0 %v313_v0  ;;  %v55_v9 = vld [vmem:[#allocation3] sm:$0xf]  ;;  %s281_s13 = scalar_lea.vmem %s175_s12, 128  ;;  %p286_p3 = scmp.lt.s32.totalorder %s175_s12, %s175_s12 }
  0x2a   :  { %v184_v10 = vld [vmem:[%s384_s2] ss:$0 sm:$0xff]  ;;  %p282_p2 = scmp.ne.s32.totalorder %s175_s12, %s281_s13  ;;  %p287_p4 = scmp.lt.s32.totalorder %s281_s13, %s281_s13 }
  0x2c   :  { %205 = vmatpush3.bf16.msra.mxu0 %v230_v2  ;;  %p288_p5 = por %p287_p4, %p286_p3 }
  0x2d   :  { %206 = vmatprep.subr.bf16.mxu0 %v313_v0 }
  0x2e   :  { %p289_p6 = pnand %p288_p5, %p282_p2 }
  0x30   :  { %207 = vmatpush3.bf16.msra.mxu0 %v231_v3 }
  0x31   :  { %208 = vmatprep.subr.bf16.mxu0 %v313_v0 }
  0x34   :  { %209 = vmatpush3.bf16.msra.mxu0 %v232_v4 }
  0x35   :  { %210 = vmatprep.subr.bf16.mxu0 %v313_v0 }
  0x38   :  { %211 = vmatpush3.bf16.msra.mxu0 %v233_v5 }
  0x39   :  { %212 = vmatprep.subr.bf16.mxu0 %v313_v0 }
  0x3c   :  { %213 = vmatpush3.bf16.msra.mxu0 %v234_v6 }
  0x3d   :  { %214 = vmatprep.subr.bf16.mxu0 %v313_v0 }
  0x40   :  { %215 = vmatpush3.bf16.msra.mxu0 %v235_v7 }
  0x41   :  { %216 = vmatprep.subr.bf16.mxu0 %v313_v0 }
  0x44   :  { %217 = vmatpush3.bf16.msra.mxu0 %v236_v8 }
  0x47   :  { %219 = vmatmul.mubr.bf16.vlgmr.msra.gmra.mrb[0].mxu0 %v55_v9 }
 0x11a   :  { %v154_v11 = vpop.f32.mrb[0].mxu0 }
 0x11b   :  { %v160_v12 = vadd.f32 %v184_v10, %v154_v11  ;;  %v220_v13 = vpop.f32.mrb[1].mxu0 }
 0x11c   :  { %v157_v14 = vpop.f32.mrb[2].mxu0 }
 0x11d   :  { %v166_v15 = vmax.f32 %v160_v12, 0.0  ;;  %v221_v16 = vpop.f32.mrb[3].mxu0 }
 0x11f   :  { %167 = vst [vmem:[#allocation8] sm:$0xff] %v166_v15 }
 0x120   :  { %292 = shalt.err (!%p289_p6)
}
 0x121   :  { %s293_s2 = scalar_lea.hbm %s385_s3, 128 }
 0x122   :  { %p294_p7 = scmp.ne.s32.totalorder %s385_s3, %s293_s2  ;;  %p297_p8 = scmp.lt.u32.totalorder %s293_s2, %s385_s3 }
 0x124   :  { %p299_p9 = pnand %p297_p8, %p294_p7 }
 0x126   :  { %302 = shalt.err (!%p299_p9)
}
 0x127   :  { %177 = dma.vmem_to_hbm [thread:$0]  %s175_s12, 128, %s385_s3, [#allocation5]  }
 0x128   :  { %307 = dma.done.wait [#allocation5], 128  }
 0x129   :  { %308 = vsyncadd [#allocation5], 4294967168 }
 0x12a   :  { %181 = vsyncpa [#allocation4], 1 }
 0x12b   :  { %182 = vsyncpa [#allocation7], 1 }
 0x12c   :  { %183 = vsyncpa [#allocation5], 1 }

</bundles_post_ra>
